<compile_context>
chip_gen: v6e
topology: v6e:2x2x1
jax: 0.10.0
libtpu: 0.0.40
codegen_flags: <defaults>
</compile_context>

<pallas_src>
import jax
import jax.numpy as jnp
from jax import lax
from jax.experimental import pallas as pl
from jax.experimental.pallas import tpu as pltpu


def _contrastive_kernel(q_ref, o_ref, lbl_row_ref, lbl_col_ref, out_ref,
                        o_n_ref, m_col_ref, s_col_ref,
                        acc_lse_ref, acc_q_ref, acc_v_ref):
    """Row-block kernel: normalized MXU matmul, row lse, online column lse, masked gathers."""
    b = pl.program_id(0)
    tm = q_ref.shape[0]
    n = o_ref.shape[0]
    inv_n = 1.0 / n

    # --- init (first row block): normalize o once, zero accumulators -------------
    @pl.when(b == 0)
    def _init():
        o = o_ref[...].astype(jnp.float32)
        o_scale = lax.rsqrt(jnp.sum(o * o, axis=-1, keepdims=True))
        o_n_ref[...] = (o * o_scale).astype(o_n_ref.dtype)
        m_col_ref[...] = jnp.full(m_col_ref.shape, -jnp.inf, jnp.float32)
        s_col_ref[...] = jnp.zeros(s_col_ref.shape, jnp.float32)
        acc_lse_ref[...] = jnp.zeros(acc_lse_ref.shape, jnp.float32)
        acc_q_ref[...] = jnp.zeros(acc_q_ref.shape, jnp.float32)
        acc_v_ref[...] = jnp.zeros(acc_v_ref.shape, jnp.float32)

    # --- normalize this q row block; fold the 1/100 temperature into the scale ---
    q = q_ref[...].astype(jnp.float32)
    q_scale = lax.rsqrt(jnp.sum(q * q, axis=-1, keepdims=True)) * 0.01
    q_n = (q * q_scale).astype(o_n_ref.dtype)

    # sim[i, j] = (q_n[i] . o_n[j]) / 100   — contract last dims, no transpose.
    sim = lax.dot_general(q_n, o_n_ref[...],
                          dimension_numbers=(((1,), (1,)), ((), ())),
                          preferred_element_type=jnp.float32)      # [tm, n] f32

    # --- row logsumexp (loss_q statistics) ----------------------------------------
    row_max = jnp.max(sim, axis=-1, keepdims=True)                  # [tm, 1]
    row_lse = row_max + jnp.log(
        jnp.sum(jnp.exp(sim - row_max), axis=-1, keepdims=True))    # [tm, 1]
    acc_lse_ref[...] += jnp.sum(row_lse, axis=0, keepdims=True)     # (1,1)

    # gather sim[i, labels[i]] via in-kernel one-hot mask (no N^2 host mask)
    col_iota = lax.broadcasted_iota(jnp.int32, (tm, n), 1)
    mask_q = (col_iota == lbl_row_ref[...]).astype(jnp.float32)     # [tm, n]
    acc_q_ref[...] += jnp.sum(mask_q * sim, keepdims=True)          # (1,1)

    # --- column statistics of z = row-log-softmax(sim) -----------------------------
    z = sim - row_lse                                               # [tm, n]

    # gather z[labels[j], j] for rows that live in this block
    row_iota = lax.broadcasted_iota(jnp.int32, (tm, n), 0) + b * tm
    mask_v = (row_iota == lbl_col_ref[...]).astype(jnp.float32)     # [tm, n]
    acc_v_ref[...] += jnp.sum(mask_v * z, keepdims=True)            # (1,1)

    # online logsumexp over axis 0 (across row blocks)
    m_prev = m_col_ref[...]                                         # (1, n)
    m_new = jnp.maximum(m_prev, jnp.max(z, axis=0, keepdims=True))
    s_col_ref[...] = (s_col_ref[...] * jnp.exp(m_prev - m_new)
                      + jnp.sum(jnp.exp(z - m_new), axis=0, keepdims=True))
    m_col_ref[...] = m_new

    # --- finalize ------------------------------------------------------------------
    @pl.when(b == pl.num_programs(0) - 1)
    def _finalize():
        col_lse = m_col_ref[...] + jnp.log(s_col_ref[...])          # (1, n)
        loss_q = (acc_lse_ref[...] - acc_q_ref[...]) * inv_n
        loss_v = (jnp.sum(col_lse, keepdims=True) - acc_v_ref[...]) * inv_n
        out_ref[...] = ((loss_q + loss_v) * 0.5).astype(out_ref.dtype)


def contrastive_criterion(q_query, o_query, labels, *, block_rows=256):
    """Wrapper: builds tiny label vectors (glue) and launches the row-tiled Pallas kernel."""
    n, d = q_query.shape
    assert o_query.shape == (n, d)
    labels = labels.astype(jnp.int32)
    lbl_row = labels.reshape(n, 1)   # labels per row  (for loss_q gather)
    lbl_col = labels.reshape(1, n)   # labels per column (for loss_v gather)

    # Row-tile only if it divides N cleanly and respects sublane alignment;
    # otherwise fall back to a single full block.
    if n % block_rows == 0 and block_rows % 8 == 0 and block_rows < n:
        tm = block_rows
    else:
        tm = n
    # TODO(synk): pad the row axis (with masked padded rows) so N need not divide block_rows.
    grid = (n // tm,)

    # bf16 inputs stay bf16 on the MXU (f32 accumulation); f32 inputs stay f32.
    mm_dtype = jnp.bfloat16 if q_query.dtype == jnp.bfloat16 else jnp.float32

    out = pl.pallas_call(
        _contrastive_kernel,
        out_shape=jax.ShapeDtypeStruct((1, 1), jnp.float32),
        grid_spec=pltpu.PrefetchScalarGridSpec(
            num_scalar_prefetch=0,
            grid=grid,
            in_specs=[
                pl.BlockSpec((tm, d), lambda b: (b, 0)),   # q row block
                pl.BlockSpec((n, d), lambda b: (0, 0)),    # o, resident
                pl.BlockSpec((tm, 1), lambda b: (b, 0)),   # labels per row block
                pl.BlockSpec((1, n), lambda b: (0, 0)),    # labels as a lane row
            ],
            out_specs=pl.BlockSpec((1, 1), lambda b: (0, 0)),
            scratch_shapes=[
                pltpu.VMEM((n, d), mm_dtype),      # normalized o (computed once)
                pltpu.VMEM((1, n), jnp.float32),   # running column max
                pltpu.VMEM((1, n), jnp.float32),   # running column scaled sum
                pltpu.VMEM((1, 1), jnp.float32),   # sum of row lse
                pltpu.VMEM((1, 1), jnp.float32),   # sum of sim[i, labels[i]]
                pltpu.VMEM((1, 1), jnp.float32),   # sum of z[labels[j], j]
            ]),
        compiler_params=pltpu.CompilerParams(
            # Row-block axis carries the column-lse reduction -> must be sequential.
            dimension_semantics=("arbitrary",)),
    )(q_query, o_query, lbl_row, lbl_col)
    return out[0, 0]


def _reference_jax(q_query, o_query, labels):
    """Pure-JAX reference for correctness checking."""
    q = q_query / jnp.linalg.norm(q_query, axis=-1, keepdims=True)
    o = o_query / jnp.linalg.norm(o_query, axis=-1, keepdims=True)
    logits = jax.nn.log_softmax((q @ o.T) / 100.0, axis=-1)
    n = q.shape[0]
    loss_q = -jnp.mean(jax.nn.log_softmax(logits, axis=-1)[jnp.arange(n), labels])
    loss_v = -jnp.mean(jax.nn.log_softmax(logits, axis=0)[labels, jnp.arange(n)])
    return (loss_q + loss_v) / 2.0


if __name__ == "__main__":
    N, D = 16, 32  # small: 16 query/object pairs, hidden size 32

    key = jax.random.PRNGKey(0)
    kq, ko, kl = jax.random.split(key, 3)
    q_query = jax.random.normal(kq, (N, D), dtype=jnp.float32)
    o_query = jax.random.normal(ko, (N, D), dtype=jnp.float32)
    labels = jax.random.permutation(kl, jnp.arange(N, dtype=jnp.int32))

    ref = _reference_jax(q_query, o_query, labels)

    # Tiled path: 2 row blocks of 8 (exercises the online column-lse accumulation).
    loss_tiled = contrastive_criterion(q_query, o_query, labels, block_rows=8)
    jax.block_until_ready(loss_tiled)
    assert jnp.allclose(loss_tiled, ref, atol=1e-5, rtol=1e-5), (loss_tiled, ref)

    # Single-block path (grid of 1).
    loss_single = contrastive_criterion(q_query, o_query, labels, block_rows=1024)
    jax.block_until_ready(loss_single)
    assert jnp.allclose(loss_single, ref, atol=1e-5, rtol=1e-5), (loss_single, ref)

    print("KERNEL_OK")
</pallas_src>

<mosaic_0001>
module attributes {stable_mosaic.version = 11 : i64} {
  func.func @_contrastive_kernel(%arg0: i32, %arg1: memref<8x32xf32, #tpu.memory_space<vmem>>, %arg2: memref<16x32xf32, #tpu.memory_space<vmem>>, %arg3: memref<8x1xi32, #tpu.memory_space<vmem>>, %arg4: memref<1x16xi32, #tpu.memory_space<vmem>>, %arg5: memref<1x1xf32, #tpu.memory_space<vmem>>, %arg6: memref<16x32xf32, #tpu.memory_space<vmem>>, %arg7: memref<1x16xf32, #tpu.memory_space<vmem>>, %arg8: memref<1x16xf32, #tpu.memory_space<vmem>>, %arg9: memref<1x1xf32, #tpu.memory_space<vmem>>, %arg10: memref<1x1xf32, #tpu.memory_space<vmem>>, %arg11: memref<1x1xf32, #tpu.memory_space<vmem>>) attributes {dimension_semantics = [#tpu.dimension_semantics<arbitrary>], iteration_bounds = array<i64: 2>, scalar_prefetch = 0 : i64, scratch_operands = 6 : i64, tpu.core_type = #tpu.core_type<tc>, window_params = [{transform_indices = @transform_0, window_bounds = array<i64: 8, 32>}, {pipeline_mode = #tpu.pipeline_mode<synchronous>, transform_indices = @transform_1, window_bounds = array<i64: 16, 32>}, {transform_indices = @transform_2, window_bounds = array<i64: 8, 1>}, {pipeline_mode = #tpu.pipeline_mode<synchronous>, transform_indices = @transform_3, window_bounds = array<i64: 1, 16>}, {pipeline_mode = #tpu.pipeline_mode<synchronous>, transform_indices = @transform_4, window_bounds = array<i64: 1, 1>}]} {
    %c0_i32 = arith.constant 0 : i32
    %0 = arith.cmpi eq, %arg0, %c0_i32 : i32
    %1 = arith.extui %0 : i1 to i32
    %c0_i32_0 = arith.constant 0 : i32
    %2 = arith.cmpi ne, %1, %c0_i32_0 : i32
    scf.if %2 {
      %c0_38 = arith.constant 0 : index
      %c0_39 = arith.constant 0 : index
      %82 = vector.load %arg2[%c0_38, %c0_39] : memref<16x32xf32, #tpu.memory_space<vmem>>, vector<16x32xf32>
      %83 = arith.mulf %82, %82 : vector<16x32xf32>
      %cst_40 = arith.constant dense<0.000000e+00> : vector<16xf32>
      %84 = vector.multi_reduction <add>, %83, %cst_40 [1] : vector<16x32xf32> to vector<16xf32>
      %85 = vector.shape_cast %84 : vector<16xf32> to vector<16x1xf32>
      %86 = math.rsqrt %85 : vector<16x1xf32>
      %87 = vector.broadcast %86 : vector<16x1xf32> to vector<16x32xf32>
      %88 = arith.mulf %82, %87 : vector<16x32xf32>
      %c0_41 = arith.constant 0 : index
      %c0_42 = arith.constant 0 : index
      %89 = vector.load %arg6[%c0_41, %c0_42] : memref<16x32xf32, #tpu.memory_space<vmem>>, vector<16x32xf32>
      tpu.vector_store %arg6[%c0_41, %c0_42], %88 {strides = array<i32>} : memref<16x32xf32, #tpu.memory_space<vmem>>, vector<16x32xf32>,
      %cst_43 = arith.constant 0xFF800000 : f32
      %90 = vector.broadcast %cst_43 : f32 to vector<1x16xf32>
      %c0_44 = arith.constant 0 : index
      %c0_45 = arith.constant 0 : index
      %91 = vector.load %arg7[%c0_44, %c0_45] : memref<1x16xf32, #tpu.memory_space<vmem>>, vector<1x16xf32>
      tpu.vector_store %arg7[%c0_44, %c0_45], %90 {strides = array<i32>} : memref<1x16xf32, #tpu.memory_space<vmem>>, vector<1x16xf32>,
      %cst_46 = arith.constant 0.000000e+00 : f32
      %92 = vector.broadcast %cst_46 : f32 to vector<1x16xf32>
      %c0_47 = arith.constant 0 : index
      %c0_48 = arith.constant 0 : index
      %93 = vector.load %arg8[%c0_47, %c0_48] : memref<1x16xf32, #tpu.memory_space<vmem>>, vector<1x16xf32>
      tpu.vector_store %arg8[%c0_47, %c0_48], %92 {strides = array<i32>} : memref<1x16xf32, #tpu.memory_space<vmem>>, vector<1x16xf32>,
      %cst_49 = arith.constant 0.000000e+00 : f32
      %94 = vector.broadcast %cst_49 : f32 to vector<1x1xf32>
      %c0_50 = arith.constant 0 : index
      %c0_51 = arith.constant 0 : index
      %95 = vector.load %arg9[%c0_50, %c0_51] : memref<1x1xf32, #tpu.memory_space<vmem>>, vector<1x1xf32>
      tpu.vector_store %arg9[%c0_50, %c0_51], %94 {strides = array<i32>} : memref<1x1xf32, #tpu.memory_space<vmem>>, vector<1x1xf32>,
      %cst_52 = arith.constant 0.000000e+00 : f32
      %96 = vector.broadcast %cst_52 : f32 to vector<1x1xf32>
      %c0_53 = arith.constant 0 : index
      %c0_54 = arith.constant 0 : index
      %97 = vector.load %arg10[%c0_53, %c0_54] : memref<1x1xf32, #tpu.memory_space<vmem>>, vector<1x1xf32>
      tpu.vector_store %arg10[%c0_53, %c0_54], %96 {strides = array<i32>} : memref<1x1xf32, #tpu.memory_space<vmem>>, vector<1x1xf32>,
      %cst_55 = arith.constant 0.000000e+00 : f32
      %98 = vector.broadcast %cst_55 : f32 to vector<1x1xf32>
      %c0_56 = arith.constant 0 : index
      %c0_57 = arith.constant 0 : index
      %99 = vector.load %arg11[%c0_56, %c0_57] : memref<1x1xf32, #tpu.memory_space<vmem>>, vector<1x1xf32>
      tpu.vector_store %arg11[%c0_56, %c0_57], %98 {strides = array<i32>} : memref<1x1xf32, #tpu.memory_space<vmem>>, vector<1x1xf32>,
    } else {
    }
    %c0 = arith.constant 0 : index
    %c0_1 = arith.constant 0 : index
    %3 = vector.load %arg1[%c0, %c0_1] : memref<8x32xf32, #tpu.memory_space<vmem>>, vector<8x32xf32>
    %4 = arith.mulf %3, %3 : vector<8x32xf32>
    %cst = arith.constant dense<0.000000e+00> : vector<8xf32>
    %5 = vector.multi_reduction <add>, %4, %cst [1] : vector<8x32xf32> to vector<8xf32>
    %6 = vector.shape_cast %5 : vector<8xf32> to vector<8x1xf32>
    %7 = math.rsqrt %6 : vector<8x1xf32>
    %cst_2 = arith.constant 0.00999999977 : f32
    %8 = vector.broadcast %cst_2 : f32 to vector<8x1xf32>
    %9 = arith.mulf %7, %8 : vector<8x1xf32>
    %10 = vector.broadcast %9 : vector<8x1xf32> to vector<8x32xf32>
    %11 = arith.mulf %3, %10 : vector<8x32xf32>
    %c0_3 = arith.constant 0 : index
    %c0_4 = arith.constant 0 : index
    %12 = vector.load %arg6[%c0_3, %c0_4] : memref<16x32xf32, #tpu.memory_space<vmem>>, vector<16x32xf32>
    %cst_5 = arith.constant dense<0.000000e+00> : vector<8x16xf32>
    %13 = tpu.matmul %11, %12, %cst_5 {dimension_numbers = #tpu.dot_dimension_numbers<[1], [1], [0], [0], [0, 0, 1, 0], [], []>} : vector<8x32xf32>, vector<16x32xf32>, vector<8x16xf32> -> vector<8x16xf32>
    %cst_6 = arith.constant dense<0xFF800000> : vector<8xf32>
    %14 = vector.multi_reduction <maximumf>, %13, %cst_6 [1] : vector<8x16xf32> to vector<8xf32>
    %15 = vector.shape_cast %14 : vector<8xf32> to vector<8x1xf32>
    %16 = vector.broadcast %15 : vector<8x1xf32> to vector<8x16xf32>
    %17 = arith.subf %13, %16 : vector<8x16xf32>
    %18 = math.exp %17 : vector<8x16xf32>
    %cst_7 = arith.constant dense<0.000000e+00> : vector<8xf32>
    %19 = vector.multi_reduction <add>, %18, %cst_7 [1] : vector<8x16xf32> to vector<8xf32>
    %20 = vector.shape_cast %19 : vector<8xf32> to vector<8x1xf32>
    %21 = math.log %20 : vector<8x1xf32>
    %22 = arith.addf %15, %21 : vector<8x1xf32>
    %c0_8 = arith.constant 0 : index
    %c0_9 = arith.constant 0 : index
    %23 = vector.load %arg9[%c0_8, %c0_9] : memref<1x1xf32, #tpu.memory_space<vmem>>, vector<1x1xf32>
    %cst_10 = arith.constant dense<0.000000e+00> : vector<1xf32>
    %24 = vector.multi_reduction <add>, %22, %cst_10 [0] : vector<8x1xf32> to vector<1xf32>
    %25 = vector.shape_cast %24 : vector<1xf32> to vector<1x1xf32>
    %26 = arith.addf %23, %25 : vector<1x1xf32>
    %c0_11 = arith.constant 0 : index
    %c0_12 = arith.constant 0 : index
    %27 = vector.load %arg9[%c0_11, %c0_12] : memref<1x1xf32, #tpu.memory_space<vmem>>, vector<1x1xf32>
    tpu.vector_store %arg9[%c0_11, %c0_12], %26 {strides = array<i32>} : memref<1x1xf32, #tpu.memory_space<vmem>>, vector<1x1xf32>,
    %28 = tpu.iota {dimensions = array<i32: 1>} : vector<8x16xi32>
    %c0_13 = arith.constant 0 : index
    %c0_14 = arith.constant 0 : index
    %29 = vector.load %arg3[%c0_13, %c0_14] : memref<8x1xi32, #tpu.memory_space<vmem>>, vector<8x1xi32>
    %30 = vector.broadcast %29 : vector<8x1xi32> to vector<8x16xi32>
    %31 = arith.cmpi eq, %28, %30 : vector<8x16xi32>
    %32 = arith.extui %31 : vector<8x16xi1> to vector<8x16xi32>
    %33 = arith.sitofp %32 : vector<8x16xi32> to vector<8x16xf32>
    %c0_15 = arith.constant 0 : index
    %c0_16 = arith.constant 0 : index
    %34 = vector.load %arg10[%c0_15, %c0_16] : memref<1x1xf32, #tpu.memory_space<vmem>>, vector<1x1xf32>
    %35 = arith.mulf %33, %13 : vector<8x16xf32>
    %36 = vector.shape_cast %35 : vector<8x16xf32> to vector<1x8x16xf32>
    %cst_17 = arith.constant dense<0.000000e+00> : vector<1xf32>
    %37 = vector.multi_reduction <add>, %36, %cst_17 [1, 2] : vector<1x8x16xf32> to vector<1xf32>
    %38 = vector.shape_cast %37 : vector<1xf32> to vector<1x1x1xf32>
    %39 = vector.extract %38[0, 0, 0] : f32 from vector<1x1x1xf32>
    %40 = vector.broadcast %39 : f32 to vector<1x1xf32>
    %41 = arith.addf %34, %40 : vector<1x1xf32>
    %c0_18 = arith.constant 0 : index
    %c0_19 = arith.constant 0 : index
    %42 = vector.load %arg10[%c0_18, %c0_19] : memref<1x1xf32, #tpu.memory_space<vmem>>, vector<1x1xf32>
    tpu.vector_store %arg10[%c0_18, %c0_19], %41 {strides = array<i32>} : memref<1x1xf32, #tpu.memory_space<vmem>>, vector<1x1xf32>,
    %43 = vector.broadcast %22 : vector<8x1xf32> to vector<8x16xf32>
    %44 = arith.subf %13, %43 : vector<8x16xf32>
    %45 = tpu.iota {dimensions = array<i32: 0>} : vector<8x16xi32>
    %c8_i32 = arith.constant 8 : i32
    %46 = arith.muli %arg0, %c8_i32 : i32
    %47 = vector.broadcast %46 : i32 to vector<8x16xi32>
    %48 = arith.addi %45, %47 : vector<8x16xi32>
    %c0_20 = arith.constant 0 : index
    %c0_21 = arith.constant 0 : index
    %49 = vector.load %arg4[%c0_20, %c0_21] : memref<1x16xi32, #tpu.memory_space<vmem>>, vector<1x16xi32>
    %50 = vector.broadcast %49 : vector<1x16xi32> to vector<8x16xi32>
    %51 = arith.cmpi eq, %48, %50 : vector<8x16xi32>
    %52 = arith.extui %51 : vector<8x16xi1> to vector<8x16xi32>
    %53 = arith.sitofp %52 : vector<8x16xi32> to vector<8x16xf32>
    %c0_22 = arith.constant 0 : index
    %c0_23 = arith.constant 0 : index
    %54 = vector.load %arg11[%c0_22, %c0_23] : memref<1x1xf32, #tpu.memory_space<vmem>>, vector<1x1xf32>
    %55 = arith.mulf %53, %44 : vector<8x16xf32>
    %56 = vector.shape_cast %55 : vector<8x16xf32> to vector<1x8x16xf32>
    %cst_24 = arith.constant dense<0.000000e+00> : vector<1xf32>
    %57 = vector.multi_reduction <add>, %56, %cst_24 [1, 2] : vector<1x8x16xf32> to vector<1xf32>
    %58 = vector.shape_cast %57 : vector<1xf32> to vector<1x1x1xf32>
    %59 = vector.extract %58[0, 0, 0] : f32 from vector<1x1x1xf32>
    %60 = vector.broadcast %59 : f32 to vector<1x1xf32>
    %61 = arith.addf %54, %60 : vector<1x1xf32>
    %c0_25 = arith.constant 0 : index
    %c0_26 = arith.constant 0 : index
    %62 = vector.load %arg11[%c0_25, %c0_26] : memref<1x1xf32, #tpu.memory_space<vmem>>, vector<1x1xf32>
    tpu.vector_store %arg11[%c0_25, %c0_26], %61 {strides = array<i32>} : memref<1x1xf32, #tpu.memory_space<vmem>>, vector<1x1xf32>,
    %c0_27 = arith.constant 0 : index
    %c0_28 = arith.constant 0 : index
    %63 = vector.load %arg7[%c0_27, %c0_28] : memref<1x16xf32, #tpu.memory_space<vmem>>, vector<1x16xf32>
    %cst_29 = arith.constant dense<0xFF800000> : vector<16xf32>
    %64 = vector.multi_reduction <maximumf>, %44, %cst_29 [0] : vector<8x16xf32> to vector<16xf32>
    %65 = vector.shape_cast %64 : vector<16xf32> to vector<1x16xf32>
    %66 = arith.maximumf %63, %65 : vector<1x16xf32>
    %c0_30 = arith.constant 0 : index
    %c0_31 = arith.constant 0 : index
    %67 = vector.load %arg8[%c0_30, %c0_31] : memref<1x16xf32, #tpu.memory_space<vmem>>, vector<1x16xf32>
    %68 = arith.subf %63, %66 : vector<1x16xf32>
    %69 = math.exp %68 : vector<1x16xf32>
    %70 = arith.mulf %67, %69 : vector<1x16xf32>
    %71 = vector.broadcast %66 : vector<1x16xf32> to vector<8x16xf32>
    %72 = arith.subf %44, %71 : vector<8x16xf32>
    %73 = math.exp %72 : vector<8x16xf32>
    %cst_32 = arith.constant dense<0.000000e+00> : vector<16xf32>
    %74 = vector.multi_reduction <add>, %73, %cst_32 [0] : vector<8x16xf32> to vector<16xf32>
    %75 = vector.shape_cast %74 : vector<16xf32> to vector<1x16xf32>
    %76 = arith.addf %70, %75 : vector<1x16xf32>
    %c0_33 = arith.constant 0 : index
    %c0_34 = arith.constant 0 : index
    %77 = vector.load %arg8[%c0_33, %c0_34] : memref<1x16xf32, #tpu.memory_space<vmem>>, vector<1x16xf32>
    tpu.vector_store %arg8[%c0_33, %c0_34], %76 {strides = array<i32>} : memref<1x16xf32, #tpu.memory_space<vmem>>, vector<1x16xf32>,
    %c0_35 = arith.constant 0 : index
    %c0_36 = arith.constant 0 : index
    %78 = vector.load %arg7[%c0_35, %c0_36] : memref<1x16xf32, #tpu.memory_space<vmem>>, vector<1x16xf32>
    tpu.vector_store %arg7[%c0_35, %c0_36], %66 {strides = array<i32>} : memref<1x16xf32, #tpu.memory_space<vmem>>, vector<1x16xf32>,
    %c1_i32 = arith.constant 1 : i32
    %79 = arith.cmpi eq, %arg0, %c1_i32 : i32
    %80 = arith.extui %79 : i1 to i32
    %c0_i32_37 = arith.constant 0 : i32
    %81 = arith.cmpi ne, %80, %c0_i32_37 : i32
    scf.if %81 {
      %c0_38 = arith.constant 0 : index
      %c0_39 = arith.constant 0 : index
      %82 = vector.load %arg7[%c0_38, %c0_39] : memref<1x16xf32, #tpu.memory_space<vmem>>, vector<1x16xf32>
      %c0_40 = arith.constant 0 : index
      %c0_41 = arith.constant 0 : index
      %83 = vector.load %arg8[%c0_40, %c0_41] : memref<1x16xf32, #tpu.memory_space<vmem>>, vector<1x16xf32>
      %84 = math.log %83 : vector<1x16xf32>
      %85 = arith.addf %82, %84 : vector<1x16xf32>
      %c0_42 = arith.constant 0 : index
      %c0_43 = arith.constant 0 : index
      %86 = vector.load %arg9[%c0_42, %c0_43] : memref<1x1xf32, #tpu.memory_space<vmem>>, vector<1x1xf32>
      %c0_44 = arith.constant 0 : index
      %c0_45 = arith.constant 0 : index
      %87 = vector.load %arg10[%c0_44, %c0_45] : memref<1x1xf32, #tpu.memory_space<vmem>>, vector<1x1xf32>
      %88 = arith.subf %86, %87 : vector<1x1xf32>
      %cst_46 = arith.constant 6.250000e-02 : f32
      %89 = vector.broadcast %cst_46 : f32 to vector<1x1xf32>
      %90 = arith.mulf %88, %89 : vector<1x1xf32>
      %91 = vector.shape_cast %85 : vector<1x16xf32> to vector<1x1x16xf32>
      %cst_47 = arith.constant dense<0.000000e+00> : vector<1xf32>
      %92 = vector.multi_reduction <add>, %91, %cst_47 [1, 2] : vector<1x1x16xf32> to vector<1xf32>
      %93 = vector.shape_cast %92 : vector<1xf32> to vector<1x1x1xf32>
      %94 = vector.extract %93[0, 0, 0] : f32 from vector<1x1x1xf32>
      %95 = vector.broadcast %94 : f32 to vector<1x1xf32>
      %c0_48 = arith.constant 0 : index
      %c0_49 = arith.constant 0 : index
      %96 = vector.load %arg11[%c0_48, %c0_49] : memref<1x1xf32, #tpu.memory_space<vmem>>, vector<1x1xf32>
      %97 = arith.subf %95, %96 : vector<1x1xf32>
      %cst_50 = arith.constant 6.250000e-02 : f32
      %98 = vector.broadcast %cst_50 : f32 to vector<1x1xf32>
      %99 = arith.mulf %97, %98 : vector<1x1xf32>
      %100 = arith.addf %90, %99 : vector<1x1xf32>
      %cst_51 = arith.constant 5.000000e-01 : f32
      %101 = vector.broadcast %cst_51 : f32 to vector<1x1xf32>
      %102 = arith.mulf %100, %101 : vector<1x1xf32>
      %c0_52 = arith.constant 0 : index
      %c0_53 = arith.constant 0 : index
      %103 = vector.load %arg5[%c0_52, %c0_53] : memref<1x1xf32, #tpu.memory_space<vmem>>, vector<1x1xf32>
      tpu.vector_store %arg5[%c0_52, %c0_53], %102 {strides = array<i32>} : memref<1x1xf32, #tpu.memory_space<vmem>>, vector<1x1xf32>,
    } else {
    }
    return
  }
  func.func @transform_0(%arg0: i32) -> (i32, i32) {
    %c0_i32 = arith.constant 0 : i32
    %c0_i32_0 = arith.constant 0 : i32
    return %arg0, %c0_i32 : i32, i32
  }
  func.func @transform_1(%arg0: i32) -> (i32, i32) {
    %c0_i32 = arith.constant 0 : i32
    %c0_i32_0 = arith.constant 0 : i32
    %c0_i32_1 = arith.constant 0 : i32
    return %c0_i32, %c0_i32_0 : i32, i32
  }
  func.func @transform_2(%arg0: i32) -> (i32, i32) {
    %c0_i32 = arith.constant 0 : i32
    %c0_i32_0 = arith.constant 0 : i32
    return %arg0, %c0_i32 : i32, i32
  }
  func.func @transform_3(%arg0: i32) -> (i32, i32) {
    %c0_i32 = arith.constant 0 : i32
    %c0_i32_0 = arith.constant 0 : i32
    %c0_i32_1 = arith.constant 0 : i32
    return %c0_i32, %c0_i32_0 : i32, i32
  }
  func.func @transform_4(%arg0: i32) -> (i32, i32) {
    %c0_i32 = arith.constant 0 : i32
    %c0_i32_0 = arith.constant 0 : i32
    %c0_i32_1 = arith.constant 0 : i32
    return %c0_i32, %c0_i32_0 : i32, i32
  }
}

</mosaic_0001>

<bundles_post_ra>
// kernel: tpu_custom_call.1
= control target key start
LH: loop header
LB: loop body
LE: loop exit
PB: predicated region body
PF: predicated region fallthrough
CT: control target
= control target key end

     0   :  { %9 = vsyncpa [#allocation9], 0  ;;  %s815_s0 = inlined_call_operand.vmem [shape: f32[16,32], index: 0, kind: input, shape index: {}]   ;;  %s816_s1 = inlined_call_operand.hbm [shape: f32[16,32], index: 1, kind: input, shape index: {}]   ;;  %s817_s2 = inlined_call_operand.vmem [shape: s32[16,1], index: 2, kind: input, shape index: {}]   ;;  %s818_s3 = inlined_call_operand.vmem [shape: s32[1,16], index: 3, kind: input, shape index: {}]   ;;  %s819_s4 = inlined_call_operand.hbm [shape: f32[1,1], index: 4, kind: output, shape index: {}]  }
   0x1   :  { %10 = vsyncpa [#allocation10], 0  ;;  %s729_s15 = smov 0  }
   0x2 LB: > { %s735_s16 = sadd.s32 4294967295, %s693_s15   ;;  %p542_p0 = scmp.ge.s32.totalorder %s693_s15, 1  ;;  %s693_s15 = sphi %s729_s15, %s16_s15  }
   0x3   : > { %p136_p1 = scmp.lt.s32.totalorder %s693_s15, 3  ;;  %s695_s17 = smov [#allocation8]  }
   0x4   : > { %s148_s18 = sshll.u32 %s695_s17, 4  ;;  %p590_p4 = scmp.eq.s32.totalorder %s735_s16, 0  ;;  %s149_s18 = int_to_ptr.vmem [resolvable:$true] %s148_s18 }
   0x5   : > { %p740_p3 = pnand %p542_p0, %p136_p1  ;;  %s640_s20 = scalar_lea.vmem %s149_s18, 256 }
   0x6   : > { %p641_p8 = scmp.ne.s32.totalorder %s149_s18, %s640_s20  ;;  %p648_p11 = scmp.lt.s32.totalorder %s149_s18, %s149_s18 }
   0x7   : > { %p586_p5 = pneg %p740_p3  ;;  %p649_p12 = scmp.lt.s32.totalorder %s640_s20, %s640_s20 }
   0x9   : > { %p587_p6 = pnand %p590_p4, %p586_p5  ;;  %p650_p13 = por %p649_p12, %p648_p11 }
   0xb   : > { %p631_p7 = pneg %p587_p6 }
   0xd   : > { %p643_p9 = pnand %p641_p8, %p631_p7 }
   0xf   : > { %p644_p10 = pneg %p643_p9 }
  0x11   : > { %p651_p2 = pnand %p650_p13, %p644_p10 }
  0x13   : > { %654 = shalt.err (!%p651_p2)
}
  0x14   : > { %s696_s21 = smov 128   ;;  %s697_s22 = smov 8  }
  0x15   : > { %589 = dma.hbm_to_vmem [thread:$0]  (!%p587_p6), %s816_s1, 256, %s149_s18, [#allocation9], %s696_s21, %s696_s21, %s697_s22  }
  0x16   : > { %181 = sbr.rel (%p740_p3) target bundleno = 1320 (0x528), region = 36 }
  0x1b   : > { %684 = dma.done.wait (%p590_p4), [#allocation9], 256  }
  0x1c   : > { %686 = vsyncadd (%p590_p4), [#allocation9], 4294967040  ;;  %p205_p0 = scmp.lt.s32.totalorder %s735_s16, 1  ;;  %p821_p1 = scmp.ne.s32.totalorder %s735_s16, 0 }
  0x1e   : > { %s206_s25 = scalar_select %p205_p0, %s735_s16, 1 }
  0x1f   : > { %216 = sbr.rel (%p821_p1) target bundleno = 199 (0xc7), region = 44 }
  0x20   : > { %s547_s26 = sshll.u32 %s206_s25, 3 }
  0x21   : > { %s763_s29 = scalar_lea.vmem %s815_s0, %s547_s26  ;;  %s768_s6 = scalar_lea.vmem %s817_s2, %s547_s26 }
  0x24   : > { %v217_v0 = vld [vmem:[#allocation8] sm:$0xff]  ;;  %vm221_vm0 = vcmask 261120   ;;  %v218_v1 = vld [vmem:[#allocation8 + $0x8] sm:$0xff]  ;;  %vm234_vm1 = vcmask 122880   ;;  %vm237_vm2 = vcmask 0   ;;  %v698_v6 = vmov -inf  }
  0x25   : > { %v219_v2 = vmul.f32 %v217_v0, %v217_v0  ;;  %v220_v3 = vmul.f32 %v218_v1, %v218_v1  ;;  %235 = vst.msk [vmem:[#allocation3] sm:$0x1] %vm234_vm1, %v698_v6  ;;  %v699_v7 = vmov 0.0  }
  0x26   : > { %236 = vst.msk [vmem:[#allocation4] sm:$0x1] %vm234_vm1, %v699_v7 }
  0x27   : > { %v222_v4 = vsel %vm221_vm0, %v219_v2, 0.0  ;;  %v225_v5 = vsel %vm221_vm0, %v220_v3, 0.0  ;;  %238 = vst.msk [vmem:[#allocation5] sm:$0x1] %vm237_vm2, %v699_v7  ;;  %239 = vst.msk [vmem:[#allocation6] sm:$0x1] %vm237_vm2, %v699_v7 }
  0x28   : > { %223 = vadd.xlane.f32.xlu0 %v222_v4  ;;  %240 = vst.msk [vmem:[#allocation7] sm:$0x1] %vm237_vm2, %v699_v7 }
  0x2c   : > { %226 = vadd.xlane.f32.xlu0 %v225_v5 }
  0xb1   : > { %v224_v8 = vpop.xlane.xlu0 %223 }
  0xb2   : > { %611 = vrsqrt.f32 %v224_v8 }
  0xb5   : > { %v227_v9 = vpop.xlane.xlu0 %226 }
  0xb6   : > { %613 = vrsqrt.f32 %v227_v9 }
  0xbf   : > { %v612_v10 = vpop.eup %611 }
  0xc0   : > { %v230_v11 = vmul.f32 %v612_v10, %v217_v0 }
  0xc2   : > { %232 = vst.msk [vmem:[#allocation2] sm:$0xff] %vm221_vm0, %v230_v11 }
  0xc3   : > { %v614_v12 = vpop.eup %613 }
  0xc4   : > { %v231_v13 = vmul.f32 %v614_v12, %v218_v1 }
  0xc6   : > { %233 = vst.msk [vmem:[#allocation2 + $0x8] sm:$0xff] %vm221_vm0, %v231_v13 }
  0xc7 PF: > { %v241_v14 = vld [vmem:[%s763_s29] sm:$0xff]  ;;  %vm243_vm3 = vcmask 261120   ;;  %v700_v17 = vmov 0.0   ;;  %vm701_vm4 = vmmov 0   ;;  %vm331_vm5 = vcmask 130048   ;;  %s554_s7 = sshll.u32 %s735_s16, 3 }
  0xc8   : > { %v242_v15 = vmul.f32 %v241_v14, %v241_v14  ;;  %565 = vmatprep.subr.mxu0 %v700_v17  ;;  %569 = vmatprep.mubr.msk.f32.mxu0 %vm701_vm4, %v700_v17  ;;  %v702_v27 = vmov 0   ;;  %v356_v33 = vld [vmem:[%s768_s6] sm:$0xff]  ;;  %v354_v34 = vlaneseq  ;;  %v382_v41 = vstv %s554_s7  ;;  %v344_v62 = vld [vmem:[#allocation5] sm:$0x1]  ;;  %v407_v1 = vld [vmem:[#allocation3] sm:$0x1] }
  0xc9   : > { %v250_v19 = vld [vmem:[#allocation2] sm:$0xff]  ;;  %615 = vset.pattern.permute.xlu1 %v702_v27  ;;  %616 = vset.pattern.permute.xlu0 %v702_v27  ;;  %vm352_vm8 = vcmask 0   ;;  %vm438_vm9 = vcmask 122880   ;;  %p557_p2 = scmp.ne.s32.totalorder %s735_s16, 1 }
  0xca   : > { %v244_v16 = vsel %vm243_vm3, %v242_v15, 0.0  ;;  %v355_v36 = vand.u32 127, %v354_v34  ;;  %v380_v39 = vshrl.u32 %v354_v34, 7  ;;  %v555_v44 = vld [vmem:[%s818_s3] ss:$0 sm:$0xff] }
  0xcb   : > { %245 = vadd.xlane.f32.xlu0 %v244_v16 }
  0xcc   : > { %v383_v43 = vadd.s32 %v382_v41, %v380_v39  ;;  %v424_v3 = vsub.s32 0, %v380_v39 }
  0xcd   : > { %v251_v18 = vld [vmem:[#allocation2 + $0x8] sm:$0xff] }
  0xce   : > { %566 = vmatpush3.xpose.msk.msra.mxu0 %vm243_vm3, %v251_v18  ;;  %vm389_vm7 = vcmp.eq.s32.totalorder %v383_v43, %v555_v44  ;;  %v416_v18 = vld [vmem:[#allocation4] sm:$0x1] }
  0xcf   : > { %567 = vmatprep.subr.mxu0 %v700_v17  ;;  %v556_v48 = vsel %vm389_vm7, 1.0, %v700_v17 }
  0xd2   : > { %568 = vmatpush3.xpose.msk.msra.mxu0 %vm243_vm3, %v250_v19 }
 0x154   : > { %v246_v20 = vpop.xlane.xlu0 %245 }
 0x155   : > { %617 = vrsqrt.f32 %v246_v20 }
 0x162   : > { %v618_v21 = vpop.eup %617 }
 0x163   : > { %v248_v22 = vmul.f32 0.01, %v618_v21 }
 0x165   : > { %v249_v23 = vmul.f32 %v248_v22, %v241_v14 }
 0x167   : > { %570 = vmatmul.mubr.msk.f32.vlgmr.msra.gmra.mxu0 %vm243_vm3, %v249_v23 }
 0x227   : > { %v327_v24 = vpop.f32.mrf.mxu0 }
 0x228   : > { %v332_v25 = vsel %vm331_vm5, %v327_v24, -inf }
 0x229   : > { %333 = vmax.xlane.f32.xlu0 %v332_v25  ;;  %v571_v26 = vpop.f32.mrf.mxu0 }
 0x2b2   : > { %v334_v28 = vpop.xlane.xlu0 %333 }
 0x2b3   : > { %v335_v29 = vsub.f32 %v327_v24, %v334_v28 }
 0x2b5   : > { %v336_v30 = vmul.f32 1.442695, %v335_v29 }
 0x2b7   : > { %619 = vpow2.f32 %v336_v30 }
 0x2c4   : > { %v620_v31 = vpop.eup %619 }
 0x2c5   : > { %v338_v32 = vsel %vm331_vm5, %v620_v31, 0.0 }
 0x2c6   : > { %339 = vadd.xlane.f32.xlu1 %v338_v32 }
 0x2d7   : > { %358 = vperm.xlu1 %615, %v356_v33  }
 0x34f   : > { %v340_v35 = vpop.xlane.xlu1 %339 }
 0x350   : > { %621 = vlog2.f32 %v340_v35 }
 0x353   : > { %v359_v37 = vpop.permute.xlu1 %358 }
 0x354   : > { %vm360_vm6 = vcmp.eq.s32.totalorder %v355_v36, %v359_v37  ;;  %v363_v37 = vld [vmem:[#allocation6] sm:$0x1] }
 0x355   : > { %v553_v38 = vsel %vm360_vm6, 1.0, %v700_v17 }
 0x356   : > { %v364_v40 = vmul.f32 %v553_v38, %v327_v24 }
 0x358   : > { %v365_v42 = vsel %vm331_vm5, %v364_v40, 0.0  ;;  %v392_v40 = vld [vmem:[#allocation7] sm:$0x1] }
 0x359   : > { %366 = vadd.xlane.f32.xlu0 %v365_v42 }
 0x35d   : > { %v622_v45 = vpop.eup %621 }
 0x35e   : > { %v342_v46 = vmul.f32 0.6931472, %v622_v45 }
 0x360   : > { %v343_v47 = vadd.f32 %v342_v46, %v334_v28 }
 0x362   : > { %v345_v49 = vrot.slane %v343_v47, 4  ;;  %v378_v50 = vsub.f32 %v327_v24, %v343_v47 }
 0x364   : > { %v346_v51 = vadd.f32 %v345_v49, %v343_v47  ;;  %v393_v52 = vmul.f32 %v556_v48, %v378_v50  ;;  %v408_v53 = vsel %vm331_vm5, %v378_v50, -inf }
 0x365   : > { %v409_v54 = vrot.slane %v408_v53, 4 }
 0x366   : > { %v347_v55 = vrot.slane %v346_v51, 2  ;;  %v394_v56 = vsel %vm331_vm5, %v393_v52, 0.0 }
 0x367   : > { %v410_v57 = vmax.f32 %v408_v53, %v409_v54  ;;  %395 = vadd.xlane.f32.xlu0 %v394_v56 }
 0x368   : > { %v348_v58 = vadd.f32 %v347_v55, %v346_v51 }
 0x369   : > { %v411_v59 = vrot.slane %v410_v57, 2 }
 0x36a   : > { %v349_v60 = vrot.slane %v348_v58, 1 }
 0x36b   : > { %v412_v61 = vmax.f32 %v410_v57, %v411_v59 }
 0x36c   : > { %v350_v63 = vadd.f32 %v349_v60, %v348_v58 }
 0x36d   : > { %v413_v0 = vrot.slane %v412_v61, 1 }
 0x36e   : > { %v351_v2 = vadd.f32 %v350_v63, %v344_v62 }
 0x36f   : > { %v414_v4 = vmax.f32 %v412_v61, %v413_v0 }
 0x370   : > { %353 = vst.msk [vmem:[#allocation5] sm:$0x1] %vm352_vm8, %v351_v2 }
 0x371   : > { %v415_v5 = vmax.f32 %v407_v1, %v414_v4 }
 0x373   : > { %v425_v6 = vrot.slane %v415_v5, %v424_v3  ;;  %440 = vst.msk [vmem:[#allocation3] sm:$0x1] %vm438_vm9, %v415_v5  ;;  %v417_v9 = vsub.f32 %v407_v1, %v415_v5 }
 0x375   : > { %v427_v7 = vsub.f32 %v378_v50, %v425_v6  ;;  %v418_v10 = vmul.f32 1.442695, %v417_v9 }
 0x377   : > { %v428_v8 = vmul.f32 1.442695, %v427_v7 }
 0x379   : > { %623 = vpow2.f32 %v428_v8 }
 0x37a   : > { %625 = vpow2.f32 %v418_v10 }
 0x386   : > { %v624_v11 = vpop.eup %623 }
 0x387   : > { %v430_v12 = vsel %vm331_vm5, %v624_v11, 0.0  ;;  %v626_v17 = vpop.eup %625 }
 0x388   : > { %v431_v13 = vrot.slane %v430_v12, 4  ;;  %v420_v20 = vmul.f32 %v626_v17, %v416_v18 }
 0x38a   : > { %v432_v14 = vadd.f32 %v431_v13, %v430_v12 }
 0x38c   : > { %v433_v15 = vrot.slane %v432_v14, 2 }
 0x38e   : > { %v434_v16 = vadd.f32 %v433_v15, %v432_v14 }
 0x390   : > { %v435_v19 = vrot.slane %v434_v16, 1 }
 0x392   : > { %v436_v21 = vadd.f32 %v435_v19, %v434_v16 }
 0x394   : > { %v437_v22 = vadd.f32 %v436_v21, %v420_v20 }
 0x396   : > { %439 = vst.msk [vmem:[#allocation4] sm:$0x1] %vm438_vm9, %v437_v22 }
 0x3e2   : > { %v367_v23 = vpop.xlane.xlu0 %366 }
 0x3e3   : > { %v368_v24 = vrot.slane %v367_v23, 4 }
 0x3e5   : > { %v369_v25 = vadd.f32 %v368_v24, %v367_v23 }
 0x3e7   : > { %v370_v26 = vrot.slane %v369_v25, 2 }
 0x3e9   : > { %v371_v27 = vadd.f32 %v370_v26, %v369_v25 }
 0x3eb   : > { %v372_v28 = vrot.slane %v371_v27, 1 }
 0x3ed   : > { %v373_v29 = vadd.f32 %v372_v28, %v371_v27 }
 0x3ef   : > { %572 = vpush %v373_v29 }
 0x3f0   : > { %v396_v30 = vpop.xlane.xlu0 %395 }
 0x3f1   : > { %v397_v31 = vrot.slane %v396_v30, 4 }
 0x3f3   : > { %v398_v32 = vadd.f32 %v397_v31, %v396_v30 }
 0x3f5   : > { %v399_v33 = vrot.slane %v398_v32, 2 }
 0x3f7   : > { %v400_v34 = vadd.f32 %v399_v33, %v398_v32 }
 0x3f9   : > { %v401_v35 = vrot.slane %v400_v34, 1 }
 0x3fb   : > { %v402_v36 = vadd.f32 %v401_v35, %v400_v34 }
 0x3fd   : > { %574 = vpush %v402_v36 }
 0x420   : > { %s573_s10 = spop %572 }
 0x421   : > { %v375_v38 = vstv %s573_s10 }
 0x422   : > { %v376_v39 = vadd.f32 %v375_v38, %v363_v37 }
 0x424   : > { %377 = vst.msk [vmem:[#allocation6] sm:$0x1] %vm352_vm8, %v376_v39 }
 0x42e   : > { %s575_s11 = spop %574  ;;  %444 = sbr.rel (%p557_p2) target bundleno = 1305 (0x519), region = 48 }
 0x42f   : > { %v404_v41 = vstv %s575_s11 }
 0x430   : > { %v405_v42 = vadd.f32 %v404_v41, %v392_v40 }
 0x432   : > { %406 = vst.msk [vmem:[#allocation7] sm:$0x1] %vm352_vm8, %v405_v42 }
 0x433   : > { %v446_v43 = vld [vmem:[#allocation4] sm:$0x1]  ;;  %v445_v45 = vld [vmem:[#allocation3] sm:$0x1]  ;;  %v450_v56 = vld [vmem:[#allocation5] sm:$0x1] }
 0x434   : > { %627 = vlog2.f32 %v446_v43  ;;  %v451_v57 = vld [vmem:[#allocation6] sm:$0x1] }
 0x435   : > { %v452_v58 = vsub.f32 %v450_v56, %v451_v57 }
 0x437   : > { %v453_v61 = vmul.f32 0.0625, %v452_v58 }
 0x439   : > { %v465_v59 = vld [vmem:[#allocation7] sm:$0x1] }
 0x441   : > { %v628_v44 = vpop.eup %627 }
 0x442   : > { %v448_v46 = vmul.f32 0.6931472, %v628_v44 }
 0x444   : > { %v449_v47 = vadd.f32 %v448_v46, %v445_v45 }
 0x446   : > { %v454_v48 = vsel %vm438_vm9, %v449_v47, 0.0 }
 0x447   : > { %455 = vadd.xlane.f32.xlu0 %v454_v48 }
 0x4d0   : > { %v456_v49 = vpop.xlane.xlu0 %455 }
 0x4d1   : > { %v457_v50 = vrot.slane %v456_v49, 4 }
 0x4d3   : > { %v458_v51 = vadd.f32 %v457_v50, %v456_v49 }
 0x4d5   : > { %v459_v52 = vrot.slane %v458_v51, 2 }
 0x4d7   : > { %v460_v53 = vadd.f32 %v459_v52, %v458_v51 }
 0x4d9   : > { %v461_v54 = vrot.slane %v460_v53, 1 }
 0x4db   : > { %v462_v55 = vadd.f32 %v461_v54, %v460_v53 }
 0x4dd   : > { %576 = vpush %v462_v55 }
 0x50e   : > { %s577_s12 = spop %576 }
 0x50f   : > { %v464_v60 = vstv %s577_s12 }
 0x510   : > { %v466_v62 = vsub.f32 %v464_v60, %v465_v59 }
 0x512   : > { %v467_v63 = vmul.f32 0.0625, %v466_v62 }
 0x514   : > { %v468_v0 = vadd.f32 %v467_v63, %v453_v61 }
 0x516   : > { %v469_v1 = vmul.f32 0.5, %v468_v0 }
 0x518   : > { %470 = vst.msk [vmem:[#allocation11] sm:$0x1] %vm352_vm8, %v469_v1 }
 0x519 PF: > { %p592_p3 = scmp.eq.s32.totalorder %s735_s16, 1  ;;  %s703_s13 = smov [#allocation11]  }
 0x51a   : > { %s478_s14 = sshll.u32 %s703_s13, 4  ;;  %s479_s14 = int_to_ptr.vmem [resolvable:$true] %s478_s14 }
 0x51b   : > { %s655_s17 = scalar_lea.vmem %s479_s14, 16  ;;  %s661_s18 = scalar_lea.vmem %s479_s14, 32 }
 0x51c   : > { %p656_p4 = scmp.ne.s32.totalorder %s479_s14, %s655_s17  ;;  %p662_p7 = scmp.lt.s32.totalorder %s479_s14, %s479_s14 }
 0x51d   : > { %p663_p8 = scmp.lt.s32.totalorder %s661_s18, %s655_s17 }
 0x51e   : > { %p657_p5 = pnand %p656_p4, %p592_p3 }
 0x51f   : > { %p664_p9 = por %p663_p8, %p662_p7 }
 0x520   : > { %p658_p6 = pneg %p657_p5 }
 0x522   : > { %p665_p10 = pnand %p664_p9, %p658_p6 }
 0x524   : > { %668 = shalt.err (!%p665_p10)
}
 0x525   : > { %583 = dma.vmem_to_hbm [thread:$0]  (%p592_p3), %s479_s14, 16, %s819_s4, [#allocation10]  }
 0x526   : > { %688 = dma.done.wait (%p592_p3), [#allocation10], 16  }
 0x527   : > { %690 = vsyncadd (%p592_p3), [#allocation10], 4294967280 }
 0x528 PF: > { %s16_s15 = sadd.s32 1, %s693_s15  }
 0x529   : > { %p13_p11 = scmp.ge.s32.totalorder %s16_s15, 4  }
 0x52b   :  { %15 = sbr.rel (!%p13_p11) target bundleno = 2 (0x2), region = 79 }
 0x530   :  { %491 = vsyncpa [#allocation9], 1 }
 0x531   :  { %493 = vsyncpa [#allocation9 + $0x1], 1 }
 0x532   :  { %494 = vsyncpa [#allocation10], 1 }
 0x533   :  { %496 = vsyncpa [#allocation10 + $0x1], 1 }

</bundles_post_ra>
